<compile_context>
chip_gen: v7x
topology: tpu7x:2x2x1
jax: 0.10.0
libtpu: 0.0.40
codegen_flags: <defaults>
</compile_context>

<pallas_src>
import functools

import jax
import jax.numpy as jnp
from jax.experimental import pallas as pl
from jax.experimental.pallas import tpu as pltpu


def _cross_module_kernel(x_ref, w1_ref, t1_ref, w2_ref, t2_ref, o_ref):
    """o = relu(relu(x @ W1 + t1) @ W2 + t2); BN/bias pre-folded into W/t."""
    h = jnp.dot(x_ref[...], w1_ref[...], preferred_element_type=jnp.float32)
    h = jnp.maximum(h + t1_ref[...], 0.0)                # f32 epilogue

    # TODO(synk): Dropout is identity in eval mode; training-mode Bernoulli
    # masking is intentionally not emulated here.

    o = jnp.dot(h.astype(jnp.bfloat16), w2_ref[...],
                preferred_element_type=jnp.float32)
    o_ref[...] = jnp.maximum(o + t2_ref[...], 0.0).astype(o_ref.dtype)


def prepare_params(params, eps=1e-5):
    """One-time fold of Linear bias + BatchNorm into weights/shifts (host side).

    Returns a single bf16 W1 ([Dt+Di, H], BN scale folded in), bf16 W2 and
    f32 per-feature shifts.  Call once per model, NOT per forward pass.
    """
    s1 = params["bn1_gamma"] / jnp.sqrt(params["bn1_var"] + eps)
    t1 = (params["b1"] - params["bn1_mean"]) * s1 + params["bn1_beta"]
    s2 = params["bn2_gamma"] / jnp.sqrt(params["bn2_var"] + eps)
    t2 = (params["b2"] - params["bn2_mean"]) * s2 + params["bn2_beta"]

    w1 = (params["w1"] * s1[None, :]).astype(jnp.bfloat16)   # [Din, H]
    w2 = (params["w2"] * s2[None, :]).astype(jnp.bfloat16)   # [H, Dout]
    H, Dout = w2.shape
    return dict(
        w1=w1, w2=w2,
        t1=t1.astype(jnp.float32).reshape(1, H),
        t2=t2.astype(jnp.float32).reshape(1, Dout),
    )


def _batch_tile(B, tb):
    """Pick the batch tile: big to amortize grid overhead, >=2 blocks when
    possible (both v7x TensorCores get work), 8-row aligned (sublane)."""
    if B <= 8:
        return B                                # one full block (== array dim)
    if B <= tb:
        half = (B + 1) // 2                     # split -> 2 parallel grid steps
        return min(tb, max(8, ((half + 7) // 8) * 8))
    return tb


@functools.partial(jax.jit, static_argnames=("tb", "out_dtype"))
def cross_module_forward(text, image, folded, *, tb=2048, out_dtype=jnp.float32):
    """JAX/Pallas equivalent of CrossModule.forward (eval mode)."""
    B = text.shape[0]
    Din, H = folded["w1"].shape
    Dout = folded["w2"].shape[1]

    # torch.cat((text, image), 1) + cast to the MXU-native activation dtype.
    x = jnp.concatenate((text, image), axis=1).astype(jnp.bfloat16)

    TB = _batch_tile(B, tb)
    grid = (pl.cdiv(B, TB),)        # ragged last block: Pallas masks OOB writes

    out_itemsize = jnp.dtype(out_dtype).itemsize
    # Rough VMEM budget: double-buffered x/out, resident weights, h/o scratch.
    vmem_bytes = (2 * TB * Din * 2
                  + 2 * TB * Dout * out_itemsize
                  + 2 * (Din * H + H * Dout) * 2
                  + 2 * (H + Dout) * 4
                  + TB * H * (4 + 2)
                  + TB * Dout * 4)
    vmem_limit = min(64 << 20, max(32 << 20, (3 * int(vmem_bytes)) // 2))

    cost = pl.CostEstimate(
        flops=2 * B * (Din * H + H * Dout),
        transcendentals=0,
        bytes_accessed=(2 * (Din * H + H * Dout)        # bf16 weights
                        + 4 * (H + Dout)                # f32 shifts
                        + 2 * B * Din                   # bf16 activations in
                        + out_itemsize * B * Dout),     # output
    )

    return pl.pallas_call(
        _cross_module_kernel,
        out_shape=jax.ShapeDtypeStruct((B, Dout), out_dtype),
        grid=grid,
        in_specs=[
            pl.BlockSpec((TB, Din), lambda i: (i, 0)),   # activation tile
            pl.BlockSpec((Din, H), lambda i: (0, 0)),    # W1 (VMEM-resident)
            pl.BlockSpec((1, H), lambda i: (0, 0)),      # shift 1
            pl.BlockSpec((H, Dout), lambda i: (0, 0)),   # W2 (VMEM-resident)
            pl.BlockSpec((1, Dout), lambda i: (0, 0)),   # shift 2
        ],
        out_specs=pl.BlockSpec((TB, Dout), lambda i: (i, 0)),
        compiler_params=pltpu.CompilerParams(
            dimension_semantics=("parallel",),
            vmem_limit_bytes=vmem_limit),
        cost_estimate=cost,
    )(x, folded["w1"], folded["t1"], folded["w2"], folded["t2"])


def init_params(key, in_dim, hidden=256, out_dim=512):
    """Deterministic synthetic raw parameters matching the module's shapes."""
    ks = jax.random.split(key, 8)
    # Linear weights stored as [in, out] (transpose of PyTorch's [out, in]).
    w1 = jax.random.normal(ks[0], (in_dim, hidden), jnp.float32) * 0.05
    b1 = jax.random.normal(ks[1], (hidden,), jnp.float32) * 0.05
    w2 = jax.random.normal(ks[2], (hidden, out_dim), jnp.float32) * 0.05
    b2 = jax.random.normal(ks[3], (out_dim,), jnp.float32) * 0.05
    return dict(
        w1=w1, b1=b1, w2=w2, b2=b2,
        bn1_gamma=1.0 + 0.1 * jax.random.normal(ks[4], (hidden,), jnp.float32),
        bn1_beta=0.1 * jax.random.normal(ks[5], (hidden,), jnp.float32),
        bn1_mean=jnp.zeros((hidden,), jnp.float32),
        bn1_var=jnp.ones((hidden,), jnp.float32),
        bn2_gamma=1.0 + 0.1 * jax.random.normal(ks[6], (out_dim,), jnp.float32),
        bn2_beta=0.1 * jax.random.normal(ks[7], (out_dim,), jnp.float32),
        bn2_mean=jnp.zeros((out_dim,), jnp.float32),
        bn2_var=jnp.ones((out_dim,), jnp.float32),
    )


def _reference(text, image, folded):
    """Pure-JAX reference using the same folded bf16 weights / f32 accumulation."""
    x = jnp.concatenate((text, image), axis=1).astype(jnp.bfloat16)
    h = jnp.maximum(
        jnp.dot(x, folded["w1"], preferred_element_type=jnp.float32)
        + folded["t1"], 0.0)
    o = jnp.dot(h.astype(jnp.bfloat16), folded["w2"],
                preferred_element_type=jnp.float32)
    return jnp.maximum(o + folded["t2"], 0.0)


def _reference_f32(text, image, params, eps=1e-5):
    """Full-precision f32 reference of the original module (eval mode)."""
    x = jnp.concatenate((text, image), axis=1).astype(jnp.float32)
    s1 = params["bn1_gamma"] / jnp.sqrt(params["bn1_var"] + eps)
    t1 = (params["b1"] - params["bn1_mean"]) * s1 + params["bn1_beta"]
    s2 = params["bn2_gamma"] / jnp.sqrt(params["bn2_var"] + eps)
    t2 = (params["b2"] - params["bn2_mean"]) * s2 + params["bn2_beta"]
    h = jnp.maximum(x @ params["w1"] * s1 + t1, 0.0)
    return jnp.maximum(h @ params["w2"] * s2 + t2, 0.0)


if __name__ == "__main__":
    key = jax.random.PRNGKey(0)
    k_text, k_image, k_param = jax.random.split(key, 3)

    B, Dt, Di = 8, 16, 16          # small shapes: batch=8, text/image feat=16
    text = jax.random.normal(k_text, (B, Dt), jnp.float32)
    image = jax.random.normal(k_image, (B, Di), jnp.float32)

    params = init_params(k_param, in_dim=Dt + Di, hidden=256, out_dim=512)
    folded = jax.tree_util.tree_map(jax.block_until_ready,
                                    prepare_params(params))

    out = jax.block_until_ready(cross_module_forward(text, image, folded))

    # Check vs a pure-JAX path using the identical folded bf16 weights (tight)
    ref = _reference(text, image, folded)
    assert out.shape == (B, 512), out.shape
    assert jnp.allclose(out, ref, atol=1e-2, rtol=1e-2), "mismatch vs folded ref"

    # Sanity check vs the full-f32 original-module math (loose: bf16 weights)
    ref32 = _reference_f32(text, image, params)
    assert jnp.allclose(out, ref32, atol=5e-2, rtol=5e-2), "mismatch vs f32 ref"

    # Exercise the multi-step / ragged-last-block path and bf16 output option.
    B2 = 100
    text2 = jax.random.normal(jax.random.PRNGKey(1), (B2, Dt), jnp.float32)
    image2 = jax.random.normal(jax.random.PRNGKey(2), (B2, Di), jnp.float32)
    out2 = jax.block_until_ready(
        cross_module_forward(text2, image2, folded, out_dtype=jnp.bfloat16))
    ref2 = _reference(text2, image2, folded)
    assert out2.shape == (B2, 512), out2.shape
    assert jnp.allclose(out2.astype(jnp.float32), ref2, atol=5e-2, rtol=5e-2), \
        "mismatch on ragged/bf16 path"

    print("KERNEL_OK")
</pallas_src>

<mosaic_0001>
module attributes {stable_mosaic.version = 11 : i64} {
  func.func @_cross_module_kernel(%arg0: i32, %arg1: memref<8x32xbf16, #tpu.memory_space<vmem>>, %arg2: memref<32x256xbf16, #tpu.memory_space<vmem>>, %arg3: memref<1x256xf32, #tpu.memory_space<vmem>>, %arg4: memref<256x512xbf16, #tpu.memory_space<vmem>>, %arg5: memref<1x512xf32, #tpu.memory_space<vmem>>, %arg6: memref<8x512xf32, #tpu.memory_space<vmem>>) attributes {dimension_semantics = [#tpu.dimension_semantics<parallel>], iteration_bounds = array<i64: 1>, scalar_prefetch = 0 : i64, scratch_operands = 0 : i64, tpu.core_type = #tpu.core_type<tc>, window_params = [{transform_indices = @transform_0, window_bounds = array<i64: 8, 32>}, {pipeline_mode = #tpu.pipeline_mode<synchronous>, transform_indices = @transform_1, window_bounds = array<i64: 32, 256>}, {pipeline_mode = #tpu.pipeline_mode<synchronous>, transform_indices = @transform_2, window_bounds = array<i64: 1, 256>}, {pipeline_mode = #tpu.pipeline_mode<synchronous>, transform_indices = @transform_3, window_bounds = array<i64: 256, 512>}, {pipeline_mode = #tpu.pipeline_mode<synchronous>, transform_indices = @transform_4, window_bounds = array<i64: 1, 512>}, {transform_indices = @transform_5, window_bounds = array<i64: 8, 512>}]} {
    %c0 = arith.constant 0 : index
    %c0_0 = arith.constant 0 : index
    %0 = vector.load %arg1[%c0, %c0_0] : memref<8x32xbf16, #tpu.memory_space<vmem>>, vector<8x32xbf16>
    %c0_1 = arith.constant 0 : index
    %c0_2 = arith.constant 0 : index
    %1 = vector.load %arg2[%c0_1, %c0_2] : memref<32x256xbf16, #tpu.memory_space<vmem>>, vector<32x256xbf16>
    %cst = arith.constant dense<0.000000e+00> : vector<8x256xf32>
    %2 = tpu.matmul %0, %1, %cst {dimension_numbers = #tpu.dot_dimension_numbers<[1], [0], [0], [1], [0, 0, 1, 1], [], []>} : vector<8x32xbf16>, vector<32x256xbf16>, vector<8x256xf32> -> vector<8x256xf32>
    %c0_3 = arith.constant 0 : index
    %c0_4 = arith.constant 0 : index
    %3 = vector.load %arg3[%c0_3, %c0_4] : memref<1x256xf32, #tpu.memory_space<vmem>>, vector<1x256xf32>
    %4 = vector.broadcast %3 : vector<1x256xf32> to vector<8x256xf32>
    %5 = arith.addf %2, %4 : vector<8x256xf32>
    %cst_5 = arith.constant 0.000000e+00 : f32
    %6 = vector.broadcast %cst_5 : f32 to vector<8x256xf32>
    %7 = arith.maximumf %5, %6 : vector<8x256xf32>
    %8 = arith.truncf %7 : vector<8x256xf32> to vector<8x256xbf16>
    %c0_6 = arith.constant 0 : index
    %c0_7 = arith.constant 0 : index
    %9 = vector.load %arg4[%c0_6, %c0_7] : memref<256x512xbf16, #tpu.memory_space<vmem>>, vector<256x512xbf16>
    %cst_8 = arith.constant dense<0.000000e+00> : vector<8x512xf32>
    %10 = tpu.matmul %8, %9, %cst_8 {dimension_numbers = #tpu.dot_dimension_numbers<[1], [0], [0], [1], [0, 0, 1, 1], [], []>} : vector<8x256xbf16>, vector<256x512xbf16>, vector<8x512xf32> -> vector<8x512xf32>
    %c0_9 = arith.constant 0 : index
    %c0_10 = arith.constant 0 : index
    %11 = vector.load %arg5[%c0_9, %c0_10] : memref<1x512xf32, #tpu.memory_space<vmem>>, vector<1x512xf32>
    %12 = vector.broadcast %11 : vector<1x512xf32> to vector<8x512xf32>
    %13 = arith.addf %10, %12 : vector<8x512xf32>
    %cst_11 = arith.constant 0.000000e+00 : f32
    %14 = vector.broadcast %cst_11 : f32 to vector<8x512xf32>
    %15 = arith.maximumf %13, %14 : vector<8x512xf32>
    %c0_12 = arith.constant 0 : index
    %c0_13 = arith.constant 0 : index
    %16 = vector.load %arg6[%c0_12, %c0_13] : memref<8x512xf32, #tpu.memory_space<vmem>>, vector<8x512xf32>
    tpu.vector_store %arg6[%c0_12, %c0_13], %15 {strides = array<i32>} : memref<8x512xf32, #tpu.memory_space<vmem>>, vector<8x512xf32>,
    return
  }
  func.func @transform_0(%arg0: i32) -> (i32, i32) {
    %c0_i32 = arith.constant 0 : i32
    %c0_i32_0 = arith.constant 0 : i32
    return %arg0, %c0_i32 : i32, i32
  }
  func.func @transform_1(%arg0: i32) -> (i32, i32) {
    %c0_i32 = arith.constant 0 : i32
    %c0_i32_0 = arith.constant 0 : i32
    %c0_i32_1 = arith.constant 0 : i32
    return %c0_i32, %c0_i32_0 : i32, i32
  }
  func.func @transform_2(%arg0: i32) -> (i32, i32) {
    %c0_i32 = arith.constant 0 : i32
    %c0_i32_0 = arith.constant 0 : i32
    %c0_i32_1 = arith.constant 0 : i32
    return %c0_i32, %c0_i32_0 : i32, i32
  }
  func.func @transform_3(%arg0: i32) -> (i32, i32) {
    %c0_i32 = arith.constant 0 : i32
    %c0_i32_0 = arith.constant 0 : i32
    %c0_i32_1 = arith.constant 0 : i32
    return %c0_i32, %c0_i32_0 : i32, i32
  }
  func.func @transform_4(%arg0: i32) -> (i32, i32) {
    %c0_i32 = arith.constant 0 : i32
    %c0_i32_0 = arith.constant 0 : i32
    %c0_i32_1 = arith.constant 0 : i32
    return %c0_i32, %c0_i32_0 : i32, i32
  }
  func.func @transform_5(%arg0: i32) -> (i32, i32) {
    %c0_i32 = arith.constant 0 : i32
    %c0_i32_0 = arith.constant 0 : i32
    return %arg0, %c0_i32 : i32, i32
  }
}

</mosaic_0001>

<bundles_post_ra>
// kernel: cross_module_forward.1
= control target key start
LH: loop header
LB: loop body
LE: loop exit
PB: predicated region body
PF: predicated region fallthrough
CT: control target
= control target key end

     0   :  { %10 = vsyncpa [#allocation3], 0  ;;  %s937_s0 = inlined_call_operand.vmem [shape: bf16[8,32], index: 0, kind: input, shape index: {}]   ;;  %s938_s1 = inlined_call_operand.vmem [shape: bf16[32,256], index: 1, kind: input, shape index: {}]   ;;  %s939_s2 = inlined_call_operand.vmem [shape: f32[1,256], index: 2, kind: input, shape index: {}]   ;;  %s940_s3 = inlined_call_operand.hbm [shape: bf16[256,512], index: 3, kind: input, shape index: {}]   ;;  %s941_s4 = inlined_call_operand.vmem [shape: f32[1,512], index: 4, kind: input, shape index: {}]   ;;  %s942_s5 = inlined_call_operand.hbm [shape: f32[8,512], index: 5, kind: output, shape index: {}]  }
   0x1   :  { %11 = vsyncpa [#allocation4], 0  ;;  %s857_s18 = smov [#allocation2]   ;;  %s809_s22 = scalar_lea.hbm %s940_s3, 8192 }
   0x2   :  { %s23_s19 = sshll.u32 %s857_s18, 4  ;;  %p810_p0 = scmp.ne.s32.totalorder %s940_s3, %s809_s22  ;;  %s24_s19 = int_to_ptr.vmem [resolvable:$true] %s23_s19 }
   0x3   :  { %p813_p1 = scmp.lt.u32.totalorder %s809_s22, %s940_s3 }
   0x5   :  { %p815_p2 = pnand %p813_p1, %p810_p0 }
   0x7   :  { %818 = shalt.err (!%p815_p2)
}
   0x8   :  { %s819_s27 = scalar_lea.vmem %s24_s19, 8192  ;;  %p824_p4 = scmp.lt.s32.totalorder %s24_s19, %s24_s19 }
   0x9   :  { %p820_p3 = scmp.ne.s32.totalorder %s24_s19, %s819_s27  ;;  %p825_p5 = scmp.lt.s32.totalorder %s819_s27, %s819_s27 }
   0xb   :  { %p826_p6 = por %p825_p5, %p824_p4 }
   0xd   :  { %p827_p7 = pnand %p826_p6, %p820_p3 }
   0xf   :  { %830 = shalt.err (!%p827_p7)
}
  0x10   :  { %s858_s28 = smov 256   ;;  %s859_s29 = smov 16  }
  0x11   :  { %29 = dma.hbm_to_vmem [thread:$0]  %s940_s3, 8192, %s24_s19, [#allocation3], %s858_s28, %s858_s28, %s859_s29  }
  0x12   :  { %853 = dma.done.wait [#allocation3], 8192  }
  0x13   :  { %854 = vsyncadd [#allocation3], 4294959104  ;;  %v860_v0 = vmov 0   ;;  %v707_v1 = vld [vmem:[%s938_s1 + $0x4] ss:$8 sps:$4 sm:$0xff]   ;;  %vm73_vm0 = vcmask 261120  }
  0x14   :  { %109 = vmatprep.mubr.bf16.mxu0 %v860_v0  ;;  %v709_v2 = vld [vmem:[%s938_s1] ss:$8 sps:$4 sm:$0xff]   ;;  %77 = vmatprep.subr.bf16.mxu0 %v707_v1  ;;  %v710_v3 = vld [vmem:[%s938_s1 + $0x14] ss:$8 sps:$4 sm:$0xff]   ;;  %v712_v4 = vld [vmem:[%s938_s1 + $0x10] ss:$8 sps:$4 sm:$0xff]  }
  0x15   :  { %78 = vmatpush1.bf16.msra.mxu0 %v709_v2  ;;  %v713_v5 = vld [vmem:[#allocation2 + $0x4] ss:$16 sps:$4 sm:$0xff]   ;;  %v36_v6 = vld [vmem:[%s937_s0] sm:$0xf]  ;;  %v717_v7 = vld [vmem:[#allocation2 + $0xc] ss:$16 sps:$4 sm:$0xff]  }
  0x16   :  { %79 = vmatprep.subr.bf16.mxu0 %v710_v3  ;;  %528 = vmatprep.subr.bf16.mxu1 %v713_v5  ;;  %v718_v8 = vld [vmem:[#allocation2] ss:$16 sps:$4 sm:$0xff]   ;;  %v719_v9 = vld [vmem:[#allocation2 + $0x24] ss:$16 sps:$4 sm:$0xff]   ;;  %v715_v10 = vld [vmem:[#allocation2 + $0x8] ss:$16 sps:$4 sm:$0xff]  }
  0x17   :  { %529 = vmatpush1.bf16.msra.mxu1 %v718_v8  ;;  %v723_v11 = vld [vmem:[#allocation2 + $0x2c] ss:$16 sps:$4 sm:$0xff]   ;;  %v724_v12 = vld [vmem:[#allocation2 + $0x20] ss:$16 sps:$4 sm:$0xff]   ;;  %v725_v13 = vld [vmem:[#allocation2 + $0x44] ss:$16 sps:$4 sm:$0xff]  }
  0x18   :  { %530 = vmatprep.subr.bf16.mxu1 %v719_v9  ;;  %v721_v14 = vld [vmem:[#allocation2 + $0x28] ss:$16 sps:$4 sm:$0xff]   ;;  %v729_v15 = vld [vmem:[#allocation2 + $0x4c] ss:$16 sps:$4 sm:$0xff]   ;;  %v730_v16 = vld [vmem:[#allocation2 + $0x40] ss:$16 sps:$4 sm:$0xff]  }
  0x19   :  { %80 = vmatpush1.bf16.msra.mxu0 %v712_v4  ;;  %v731_v17 = vld [vmem:[#allocation2 + $0x64] ss:$16 sps:$4 sm:$0xff]   ;;  %v727_v18 = vld [vmem:[#allocation2 + $0x48] ss:$16 sps:$4 sm:$0xff]   ;;  %v735_v19 = vld [vmem:[#allocation2 + $0x6c] ss:$16 sps:$4 sm:$0xff]  }
  0x1a   :  { %569 = vmatprep.subr.bf16.mxu0 %v717_v7  ;;  %v736_v20 = vld [vmem:[#allocation2 + $0x60] ss:$16 sps:$4 sm:$0xff]   ;;  %v737_v21 = vld [vmem:[#allocation2 + $0x84] ss:$16 sps:$4 sm:$0xff]   ;;  %v733_v22 = vld [vmem:[#allocation2 + $0x68] ss:$16 sps:$4 sm:$0xff]  }
  0x1b   :  { %531 = vmatpush1.bf16.msra.mxu1 %v724_v12  ;;  %v741_v23 = vld [vmem:[#allocation2 + $0x8c] ss:$16 sps:$4 sm:$0xff]   ;;  %v742_v24 = vld [vmem:[#allocation2 + $0x80] ss:$16 sps:$4 sm:$0xff]   ;;  %v743_v25 = vld [vmem:[#allocation2 + $0xa4] ss:$16 sps:$4 sm:$0xff]  }
  0x1c   :  { %637 = vmatmul.mubr.msk.bf16.vlgmr.msra.gmra.mrb[0].mxu0 %vm73_vm0, %v36_v6  ;;  %532 = vmatprep.subr.bf16.mxu1 %v725_v13  ;;  %v739_v26 = vld [vmem:[#allocation2 + $0x88] ss:$16 sps:$4 sm:$0xff]   ;;  %v747_v27 = vld [vmem:[#allocation2 + $0xac] ss:$16 sps:$4 sm:$0xff]   ;;  %v748_v28 = vld [vmem:[#allocation2 + $0xa0] ss:$16 sps:$4 sm:$0xff]   ;;  %v43_v6 = vlaneseq }
  0x1d   :  { %570 = vmatpush1.bf16.msra.mxu0 %v715_v10  ;;  %v749_v29 = vld [vmem:[#allocation2 + $0xc4] ss:$16 sps:$4 sm:$0xff]   ;;  %v745_v30 = vld [vmem:[#allocation2 + $0xa8] ss:$16 sps:$4 sm:$0xff]   ;;  %v753_v31 = vld [vmem:[#allocation2 + $0xcc] ss:$16 sps:$4 sm:$0xff]  }
  0x1e   :  { %571 = vmatprep.subr.bf16.mxu0 %v723_v11  ;;  %v754_v32 = vld [vmem:[#allocation2 + $0xc0] ss:$16 sps:$4 sm:$0xff]   ;;  %v755_v33 = vld [vmem:[#allocation2 + $0xe4] ss:$16 sps:$4 sm:$0xff]   ;;  %v751_v34 = vld [vmem:[#allocation2 + $0xc8] ss:$16 sps:$4 sm:$0xff]  }
  0x1f   :  { %533 = vmatpush1.bf16.msra.mxu1 %v730_v16  ;;  %v759_v35 = vld [vmem:[#allocation2 + $0xec] ss:$16 sps:$4 sm:$0xff]   ;;  %v760_v36 = vld [vmem:[#allocation2 + $0xe0] ss:$16 sps:$4 sm:$0xff]   ;;  %v761_v37 = vld [vmem:[#allocation2 + $0x104] ss:$16 sps:$4 sm:$0xff]  }
  0x20   :  { %534 = vmatprep.subr.bf16.mxu1 %v731_v17  ;;  %v757_v38 = vld [vmem:[#allocation2 + $0xe8] ss:$16 sps:$4 sm:$0xff]   ;;  %v765_v39 = vld [vmem:[#allocation2 + $0x10c] ss:$16 sps:$4 sm:$0xff]   ;;  %v766_v40 = vld [vmem:[#allocation2 + $0x100] ss:$16 sps:$4 sm:$0xff]  }
  0x21   :  { %572 = vmatpush1.bf16.msra.mxu0 %v721_v14  ;;  %v767_v41 = vld [vmem:[#allocation2 + $0x124] ss:$16 sps:$4 sm:$0xff]   ;;  %v763_v42 = vld [vmem:[#allocation2 + $0x108] ss:$16 sps:$4 sm:$0xff]   ;;  %v772_v43 = vld [vmem:[#allocation2 + $0x120] ss:$16 sps:$4 sm:$0xff]  }
  0x22   :  { %573 = vmatprep.subr.bf16.mxu0 %v729_v15  ;;  %v771_v44 = vld [vmem:[#allocation2 + $0x12c] ss:$16 sps:$4 sm:$0xff]   ;;  %v773_v45 = vld [vmem:[#allocation2 + $0x144] ss:$16 sps:$4 sm:$0xff]   ;;  %v769_v46 = vld [vmem:[#allocation2 + $0x128] ss:$16 sps:$4 sm:$0xff]  }
  0x23   :  { %535 = vmatpush1.bf16.msra.mxu1 %v736_v20  ;;  %v778_v47 = vld [vmem:[#allocation2 + $0x140] ss:$16 sps:$4 sm:$0xff]   ;;  %v777_v48 = vld [vmem:[#allocation2 + $0x14c] ss:$16 sps:$4 sm:$0xff]   ;;  %v779_v49 = vld [vmem:[#allocation2 + $0x164] ss:$16 sps:$4 sm:$0xff]  }
  0x24   :  { %536 = vmatprep.subr.bf16.mxu1 %v737_v21  ;;  %v775_v50 = vld [vmem:[#allocation2 + $0x148] ss:$16 sps:$4 sm:$0xff]   ;;  %v784_v51 = vld [vmem:[#allocation2 + $0x160] ss:$16 sps:$4 sm:$0xff]   ;;  %v783_v52 = vld [vmem:[#allocation2 + $0x16c] ss:$16 sps:$4 sm:$0xff]  }
  0x25   :  { %574 = vmatpush1.bf16.msra.mxu0 %v727_v18  ;;  %v785_v53 = vld [vmem:[#allocation2 + $0x184] ss:$16 sps:$4 sm:$0xff]   ;;  %v781_v54 = vld [vmem:[#allocation2 + $0x168] ss:$16 sps:$4 sm:$0xff]   ;;  %v790_v55 = vld [vmem:[#allocation2 + $0x180] ss:$16 sps:$4 sm:$0xff]  }
  0x26   :  { %575 = vmatprep.subr.bf16.mxu0 %v735_v19  ;;  %v789_v56 = vld [vmem:[#allocation2 + $0x18c] ss:$16 sps:$4 sm:$0xff]   ;;  %v791_v57 = vld [vmem:[#allocation2 + $0x1a4] ss:$16 sps:$4 sm:$0xff]   ;;  %v787_v58 = vld [vmem:[#allocation2 + $0x188] ss:$16 sps:$4 sm:$0xff]  }
  0x27   :  { %537 = vmatpush1.bf16.msra.mxu1 %v742_v24  ;;  %v796_v59 = vld [vmem:[#allocation2 + $0x1a0] ss:$16 sps:$4 sm:$0xff]   ;;  %v795_v60 = vld [vmem:[#allocation2 + $0x1ac] ss:$16 sps:$4 sm:$0xff]   ;;  %v793_v61 = vld [vmem:[#allocation2 + $0x1a8] ss:$16 sps:$4 sm:$0xff]  }
  0x28   :  { %538 = vmatprep.subr.bf16.mxu1 %v743_v25  ;;  %v797_v62 = vld [vmem:[#allocation2 + $0x1c4] ss:$16 sps:$4 sm:$0xff]   ;;  %v801_v63 = vld [vmem:[#allocation2 + $0x1cc] ss:$16 sps:$4 sm:$0xff]   ;;  %v799_v0 = vld [vmem:[#allocation2 + $0x1c8] ss:$16 sps:$4 sm:$0xff]  }
  0x29   :  { %576 = vmatpush1.bf16.msra.mxu0 %v733_v22  ;;  %v802_v1 = vld [vmem:[#allocation2 + $0x1c0] ss:$16 sps:$4 sm:$0xff]   ;;  %v803_v2 = vld [vmem:[#allocation2 + $0x1e4] ss:$16 sps:$4 sm:$0xff]   ;;  %v807_v3 = vld [vmem:[#allocation2 + $0x1ec] ss:$16 sps:$4 sm:$0xff]  }
  0x2a   :  { %577 = vmatprep.subr.bf16.mxu0 %v741_v23  ;;  %v805_v4 = vld [vmem:[#allocation2 + $0x1e8] ss:$16 sps:$4 sm:$0xff]   ;;  %v808_v5 = vld [vmem:[#allocation2 + $0x1e0] ss:$16 sps:$4 sm:$0xff]   ;;  %v44_v7 = vshrl.u32 %v43_v6, 7  ;;  %s861_s17 = smov [#allocation5]  }
  0x2b   :  { %539 = vmatpush1.bf16.msra.mxu1 %v748_v28  ;;  %v41_v9 = vld [vmem:[%s939_s2] sm:$0x3]  ;;  %s624_s18 = sshll.u32 %s861_s17, 4  ;;  %s625_s18 = int_to_ptr.vmem [resolvable:$true] %s624_s18 }
  0x2c   :  { %540 = vmatprep.subr.bf16.mxu1 %v749_v29  ;;  %v45_v8 = vsub.s32 0, %v44_v7  ;;  %v49_v10 = vsub.s32 1, %v44_v7  ;;  %v198_v23 = vsub.s32 2, %v44_v7  ;;  %v186_v24 = vld [vmem:[%s941_s4] sm:$0xf]  ;;  %v202_v25 = vsub.s32 3, %v44_v7  ;;  %p836_p9 = scmp.lt.s32.totalorder %s625_s18, %s625_s18 }
  0x2d   :  { %578 = vmatpush1.bf16.msra.mxu0 %v739_v26  ;;  %s831_s4 = scalar_lea.vmem %s625_s18, 512 }
  0x2e   :  { %579 = vmatprep.subr.bf16.mxu0 %v747_v27  ;;  %v46_v11 = vrot.slane %v41_v9, %v45_v8  ;;  %v50_v12 = vrot.slane %v41_v9, %v49_v10  ;;  %v191_v26 = vrot.slane %v186_v24, %v45_v8  ;;  %v199_v27 = vrot.slane %v186_v24, %v198_v23  ;;  %p832_p8 = scmp.ne.s32.totalorder %s625_s18, %s831_s4  ;;  %p837_p10 = scmp.lt.s32.totalorder %s831_s4, %s831_s4 }
  0x2f   :  { %541 = vmatpush1.bf16.msra.mxu1 %v754_v32  ;;  %v195_v28 = vrot.slane %v186_v24, %v49_v10  ;;  %v203_v29 = vrot.slane %v186_v24, %v202_v25 }
  0x30   :  { %542 = vmatprep.subr.bf16.mxu1 %v755_v33  ;;  %p838_p11 = por %p837_p10, %p836_p9 }
  0x31   :  { %580 = vmatpush1.bf16.msra.mxu0 %v745_v30 }
  0x32   :  { %581 = vmatprep.subr.bf16.mxu0 %v753_v31  ;;  %p839_p12 = pnand %p838_p11, %p832_p8 }
  0x33   :  { %543 = vmatpush1.bf16.msra.mxu1 %v760_v36 }
  0x34   :  { %544 = vmatprep.subr.bf16.mxu1 %v761_v37 }
  0x35   :  { %582 = vmatpush1.bf16.msra.mxu0 %v751_v34 }
  0x36   :  { %583 = vmatprep.subr.bf16.mxu0 %v759_v35 }
  0x37   :  { %545 = vmatpush1.bf16.msra.mxu1 %v766_v40 }
  0x38   :  { %546 = vmatprep.subr.bf16.mxu1 %v767_v41 }
  0x39   :  { %584 = vmatpush1.bf16.msra.mxu0 %v757_v38 }
  0x3a   :  { %585 = vmatprep.subr.bf16.mxu0 %v765_v39 }
  0x3b   :  { %547 = vmatpush1.bf16.msra.mxu1 %v772_v43 }
  0x3c   :  { %548 = vmatprep.subr.bf16.mxu1 %v773_v45 }
  0x3d   :  { %586 = vmatpush1.bf16.msra.mxu0 %v763_v42 }
  0x3e   :  { %587 = vmatprep.subr.bf16.mxu0 %v771_v44 }
  0x3f   :  { %549 = vmatpush1.bf16.msra.mxu1 %v778_v47 }
  0x40   :  { %550 = vmatprep.subr.bf16.mxu1 %v779_v49 }
  0x41   :  { %588 = vmatpush1.bf16.msra.mxu0 %v769_v46 }
  0x42   :  { %589 = vmatprep.subr.bf16.mxu0 %v777_v48 }
  0x43   :  { %551 = vmatpush1.bf16.msra.mxu1 %v784_v51 }
  0x44   :  { %552 = vmatprep.subr.bf16.mxu1 %v785_v53 }
  0x45   :  { %590 = vmatpush1.bf16.msra.mxu0 %v775_v50 }
  0x46   :  { %591 = vmatprep.subr.bf16.mxu0 %v783_v52 }
  0x47   :  { %553 = vmatpush1.bf16.msra.mxu1 %v790_v55 }
  0x48   :  { %554 = vmatprep.subr.bf16.mxu1 %v791_v57 }
  0x49   :  { %592 = vmatpush1.bf16.msra.mxu0 %v781_v54 }
  0x4a   :  { %593 = vmatprep.subr.bf16.mxu0 %v789_v56 }
  0x4b   :  { %555 = vmatpush1.bf16.msra.mxu1 %v796_v59 }
  0x4c   :  { %556 = vmatprep.subr.bf16.mxu1 %v797_v62 }
  0x4d   :  { %594 = vmatpush1.bf16.msra.mxu0 %v787_v58 }
  0x4e   :  { %595 = vmatprep.subr.bf16.mxu0 %v795_v60 }
  0x4f   :  { %557 = vmatpush1.bf16.msra.mxu1 %v802_v1 }
  0x50   :  { %558 = vmatprep.subr.bf16.mxu1 %v803_v2 }
  0x51   :  { %596 = vmatpush1.bf16.msra.mxu0 %v793_v61 }
  0x52   :  { %597 = vmatprep.subr.bf16.mxu0 %v801_v63 }
  0x53   :  { %559 = vmatpush1.bf16.msra.mxu1 %v808_v5 }
  0x55   :  { %598 = vmatpush1.bf16.msra.mxu0 %v799_v0 }
  0x56   :  { %599 = vmatprep.subr.bf16.mxu0 %v807_v3 }
  0x59   :  { %600 = vmatpush1.bf16.msra.mxu0 %v805_v4 }
  0xef   :  { %v111_v13 = vpop.f32.mrb[0].mxu0 }
  0xf0   :  { %v112_v14 = vadd.f32 %v111_v13, %v46_v11  ;;  %v113_v15 = vpop.f32.mrb[1].mxu0 }
  0xf1   :  { %v114_v16 = vadd.f32 %v113_v15, %v50_v12  ;;  %v115_v17 = vpop.f32.mrb[2].mxu0 }
  0xf2   :  { %v118_v18 = vmax.f32 %v112_v14, 0.0  ;;  %v116_v19 = vpop.f32.mrb[3].mxu0 }
  0xf3   :  { %v119_v20 = vmax.f32 %v114_v16, 0.0 }
  0xf4   :  { %v120_v22 = vpack.c.bf16 %v118_v18, %v118_v18 }
  0xf5   :  { %v121_v21 = vpack.c.bf16 %v119_v20, %v119_v20 }
  0xf7   :  { %560 = vmatprep.mubr.bf16.mxu1 %v121_v21  ;;  %601 = vmatprep.mubr.bf16.mxu0 %v121_v21 }
  0xf8   :  { %561 = vmatmul.mubr.bf16.vlgmr.msra.gmra.mrb[0].mxu1 %v120_v22  ;;  %602 = vmatmul.mubr.bf16.vlgmr.msra.gmra.mrb[4].mxu0 %v120_v22 }
 0x1cb   :  { %v562_v30 = vpop.f32.mrb[0].mxu1  ;;  %v603_v31 = vpop.f32.mrb[4].mxu0 }
 0x1cc   :  { %v563_v32 = vadd.f32 %v562_v30, %v191_v26  ;;  %v604_v33 = vadd.f32 %v603_v31, %v199_v27  ;;  %v564_v34 = vpop.f32.mrb[1].mxu1  ;;  %v605_v35 = vpop.f32.mrb[5].mxu0 }
 0x1cd   :  { %v565_v36 = vadd.f32 %v564_v34, %v195_v28  ;;  %v606_v37 = vadd.f32 %v605_v35, %v203_v29  ;;  %v566_v38 = vpop.f32.mrb[2].mxu1  ;;  %v607_v39 = vpop.f32.mrb[6].mxu0 }
 0x1ce   :  { %v610_v40 = vmax.f32 %v563_v32, 0.0  ;;  %v612_v41 = vmax.f32 %v604_v33, 0.0  ;;  %v567_v42 = vpop.f32.mrb[3].mxu1  ;;  %v608_v43 = vpop.f32.mrb[7].mxu0 }
 0x1cf   :  { %v611_v44 = vmax.f32 %v565_v36, 0.0  ;;  %v613_v45 = vmax.f32 %v606_v37, 0.0 }
 0x1d0   :  { %614 = vst [vmem:[#allocation5] sm:$0xff] %v610_v40  ;;  %616 = vst [vmem:[#allocation5 + $0x10] sm:$0xff] %v612_v41 }
 0x1d1   :  { %615 = vst [vmem:[#allocation5 + $0x8] sm:$0xff] %v611_v44  ;;  %617 = vst [vmem:[#allocation5 + $0x18] sm:$0xff] %v613_v45 }
 0x1d2   :  { %842 = shalt.err (!%p839_p12)
}
 0x1d3   :  { %s843_s21 = scalar_lea.hbm %s942_s5, 512 }
 0x1d4   :  { %p844_p13 = scmp.ne.s32.totalorder %s942_s5, %s843_s21  ;;  %p847_p0 = scmp.lt.u32.totalorder %s843_s21, %s942_s5 }
 0x1d6   :  { %p849_p1 = pnand %p847_p0, %p844_p13 }
 0x1d8   :  { %852 = shalt.err (!%p849_p1)
}
 0x1d9   :  { %627 = dma.vmem_to_hbm [thread:$0]  %s625_s18, 512, %s942_s5, [#allocation4]  }
 0x1da   :  { %855 = dma.done.wait [#allocation4], 512  }
 0x1db   :  { %856 = vsyncadd [#allocation4], 4294966784 }
 0x1dc   :  { %631 = vsyncpa [#allocation3], 1 }
 0x1dd   :  { %632 = vsyncpa [#allocation4], 1 }

</bundles_post_ra>
